<compile_context>
chip_gen: v7x
topology: tpu7x:2x2x1
jax: 0.10.0
libtpu: 0.0.40
codegen_flags: <defaults>
</compile_context>

<pallas_src>
import jax
import jax.numpy as jnp
from jax.experimental import pallas as pl
from jax.experimental.pallas import tpu as pltpu


# ----------------------------------------------------------------------------
# Deterministic parameter init (mirrors UNet.__init__ shapes; these params are
# intentionally unused by the forward pass, exactly like the PyTorch module).
# ----------------------------------------------------------------------------
def init_unet_params(in_channels: int, out_channels: int, key):
    k = jax.random.split(key, 3)
    return {
        # encoder: Conv2d(in_channels, 64, 3, padding=1)
        "enc_w": jax.random.normal(k[0], (64, in_channels, 3, 3), jnp.float32) * 0.02,
        "enc_b": jnp.zeros((64,), jnp.float32),
        # decoder: ConvTranspose2d(64, in_channels, 3, stride=2, padding=1, output_padding=1)
        "dec_w": jax.random.normal(k[1], (64, in_channels, 3, 3), jnp.float32) * 0.02,
        "dec_b": jnp.zeros((in_channels,), jnp.float32),
        # classifier: Conv2d(64, out_channels, 1)
        "cls_w": jax.random.normal(k[2], (out_channels, 64, 1, 1), jnp.float32) * 0.02,
        "cls_b": jnp.zeros((out_channels,), jnp.float32),
    }


# ----------------------------------------------------------------------------
# Forward pass: identity.  Highest-value perf change from the review — do not
# issue any HBM traffic or kernel launch for a semantic no-op.
# ----------------------------------------------------------------------------
def unet_forward(x: jax.Array, params=None) -> jax.Array:
    """Reproduces UNet.forward(x) -> x.  `params` accepted for API parity only."""
    return x


# ----------------------------------------------------------------------------
# Optional explicit device copy, as an optimized Pallas kernel.
# ----------------------------------------------------------------------------
def _copy_kernel(x_ref, o_ref):
    o_ref[...] = x_ref[...]


def _choose_lanes(total: int):
    # Widest lane-dense last dim (multiple of 128) that tiles the flat array.
    for lanes in (2048, 1024, 512, 256, 128):
        if total % lanes == 0:
            return lanes
    return None


def _choose_tile_rows(rows: int, row_bytes: int, budget_bytes: int = 4 * 1024 * 1024):
    # ~4 MiB per tile.  With double-buffered input + output (4 live buffers)
    # that is ~16 MiB of VMEM: fits v5e's 16 MiB scoped default and v7x's
    # 64 MiB physical VMEM with headroom; v6e has even more room.
    max_rows = max(8, (budget_bytes // max(row_bytes, 1)) // 8 * 8)
    return rows if rows <= max_rows else max_rows


@jax.jit
def unet_forward_pallas_copy(x: jax.Array) -> jax.Array:
    """Identity implemented as a lane-dense, large-tile Pallas copy."""
    orig_shape = x.shape
    total = 1
    for d in orig_shape:
        total *= d

    lanes = _choose_lanes(total)
    if lanes is None:
        # TODO(synk): element count not a multiple of 128 — fall back to a
        # single full-array block (legal, but stores are lane-masked).
        return pl.pallas_call(
            _copy_kernel,
            out_shape=jax.ShapeDtypeStruct(x.shape, x.dtype),
            input_output_aliases={0: 0},
        )(x)

    rows = total // lanes
    x2 = x.reshape(rows, lanes)
    row_bytes = lanes * jnp.dtype(x.dtype).itemsize
    tile_rows = _choose_tile_rows(rows, row_bytes)
    grid = (pl.cdiv(rows, tile_rows),)

    spec = pl.BlockSpec((tile_rows, lanes), lambda i: (i, 0))
    out = pl.pallas_call(
        _copy_kernel,
        out_shape=jax.ShapeDtypeStruct((rows, lanes), x.dtype),
        grid=grid,
        in_specs=[spec],
        out_specs=spec,
        # Alias output to input: no second HBM buffer for the copy result.
        # (Input is an internal temp from the reshape, so aliasing is free.)
        input_output_aliases={0: 0},
        compiler_params=pltpu.CompilerParams(
            dimension_semantics=("parallel",),  # shards blocks across TCs on v7x
        ),
    )(x2)
    return out.reshape(orig_shape)


if __name__ == "__main__":
    key = jax.random.PRNGKey(0)
    k_x, k_p = jax.random.split(key)

    in_channels, out_channels = 4, 3
    x = jax.random.normal(k_x, (2, in_channels, 16, 16), jnp.float32)

    # Parameters exist (as in the PyTorch module) but the forward ignores them.
    params = init_unet_params(in_channels, out_channels, k_p)

    # Module-faithful forward: pure identity, zero HBM traffic.
    y_fast = unet_forward(x, params)

    # Explicit Pallas copy kernel (run once, blocked on, verified).
    y_pallas = unet_forward_pallas_copy(x)
    y_pallas = jax.block_until_ready(y_pallas)

    assert y_fast.shape == x.shape and y_fast.dtype == x.dtype
    assert y_pallas.shape == x.shape and y_pallas.dtype == x.dtype
    assert bool(jnp.all(y_fast == x))
    assert bool(jnp.all(y_pallas == x))
    print("KERNEL_OK")
</pallas_src>

<mosaic_0001>
module attributes {stable_mosaic.version = 11 : i64} {
  func.func @_copy_kernel(%arg0: i32, %arg1: memref<1x2048xf32, #tpu.memory_space<vmem>>, %arg2: memref<1x2048xf32, #tpu.memory_space<vmem>>) attributes {dimension_semantics = [#tpu.dimension_semantics<parallel>], iteration_bounds = array<i64: 1>, scalar_prefetch = 0 : i64, scratch_operands = 0 : i64, tpu.core_type = #tpu.core_type<tc>, window_params = [{transform_indices = @transform_0, window_bounds = array<i64: 1, 2048>}, {transform_indices = @transform_1, window_bounds = array<i64: 1, 2048>}]} {
    %c0 = arith.constant 0 : index
    %c0_0 = arith.constant 0 : index
    %0 = vector.load %arg1[%c0, %c0_0] : memref<1x2048xf32, #tpu.memory_space<vmem>>, vector<1x2048xf32>
    %c0_1 = arith.constant 0 : index
    %c0_2 = arith.constant 0 : index
    %1 = vector.load %arg2[%c0_1, %c0_2] : memref<1x2048xf32, #tpu.memory_space<vmem>>, vector<1x2048xf32>
    tpu.vector_store %arg2[%c0_1, %c0_2], %0 {strides = array<i32>} : memref<1x2048xf32, #tpu.memory_space<vmem>>, vector<1x2048xf32>,
    return
  }
  func.func @transform_0(%arg0: i32) -> (i32, i32) {
    %c0_i32 = arith.constant 0 : i32
    %c0_i32_0 = arith.constant 0 : i32
    return %arg0, %c0_i32 : i32, i32
  }
  func.func @transform_1(%arg0: i32) -> (i32, i32) {
    %c0_i32 = arith.constant 0 : i32
    %c0_i32_0 = arith.constant 0 : i32
    return %arg0, %c0_i32 : i32, i32
  }
}

</mosaic_0001>

<bundles_post_ra>
// kernel: unet_forward_pallas_copy.1
= control target key start
LH: loop header
LB: loop body
LE: loop exit
PB: predicated region body
PF: predicated region fallthrough
CT: control target
= control target key end

     0   :  { %s38_s0 = inlined_call_operand.vmem [shape: f32[1,2048], index: 0, kind: input, shape index: {}, may-alias: {0,1}]   ;;  %s39_s1 = inlined_call_operand.vmem [shape: f32[1,2048], index: 1, kind: output, shape index: {}, may-alias: {0,1}]  }
   0x1   :  { %v8_v0 = vld [vmem:[%s38_s0] sm:$0xff]  ;;  %v9_v1 = vld [vmem:[%s38_s0 + $0x8] sm:$0xff] }
   0x2   :  { %10 = vst [vmem:[%s39_s1] sm:$0xff] %v8_v0  ;;  %11 = vst [vmem:[%s39_s1 + $0x8] sm:$0xff] %v9_v1 }

</bundles_post_ra>
